<compile_context>
chip_gen: v7x
topology: tpu7x:2x2x1
jax: 0.10.0
libtpu: 0.0.40
codegen_flags: <defaults>
</compile_context>

<pallas_src>
import functools

import jax
import jax.numpy as jnp
from jax.experimental import pallas as pl
from jax.experimental.pallas import tpu as pltpu

# id_to_trainid from the PyTorch module: raw label value v -> train id k
ID_TO_TRAINID = ((0, 5), (1, 6), (2, 7), (3, 11), (4, 12), (5, 13),
                 (6, 14), (7, 15), (8, 16), (9, 17), (10, 18))
IGNORE = 255


def _ins_ce_kernel(logits_ref, labels_ref, part_ref, *, hw, tile_p):
    """One grid step = one image (b) x one lane-dense (C, TP) tile of pixels."""
    i = pl.program_id(1)                                # pixel-tile index

    logits = logits_ref[...].astype(jnp.float32)        # (C, TP)  compute in f32
    raw = labels_ref[...]                               # (1, TP)  int32

    # label_copy = 255; label_copy[labels == v] = k   (raw value v -> train id k)
    target = jnp.full_like(raw, IGNORE)
    for k, v in ID_TO_TRAINID:
        target = jnp.where(raw == v, jnp.int32(k), target)

    # valid = mapped label AND inside the real image (masks the ragged tail tile,
    # so the wrapper never has to pad the logits in HBM).
    lane = jax.lax.broadcasted_iota(jnp.int32, raw.shape, 1)          # (1, TP)
    in_bounds = (i * tile_p + lane) < hw
    valid = (target >= 0) & (target != IGNORE) & in_bounds            # (1, TP)

    # softmax cross entropy per pixel: logsumexp(logits) - logits[target]
    # Class axis (=sublane axis, size C) is the reduction axis.
    m = jnp.max(logits, axis=0, keepdims=True)                        # (1, TP)
    lse = jnp.log(jnp.sum(jnp.exp(logits - m), axis=0, keepdims=True)) + m
    cls = jax.lax.broadcasted_iota(jnp.int32, logits.shape, 0)        # (C, TP)
    onehot = (cls == target).astype(jnp.float32)                      # (1,TP)->(C,TP)
    picked = jnp.sum(logits * onehot, axis=0, keepdims=True)          # (1, TP)

    per_pixel = jnp.where(valid, lse - picked, 0.0)                   # (1, TP)

    tile_sum = jnp.sum(per_pixel)
    tile_cnt = jnp.sum(valid.astype(jnp.float32))

    # Distinct (8,128) partial tile per grid step: row 0 = loss sum, row 1 = count.
    row = jax.lax.broadcasted_iota(jnp.int32, part_ref.shape, 0)
    part_ref[...] = jnp.where(row == 0, tile_sum,
                              jnp.where(row == 1, tile_cnt, 0.0))


@functools.partial(jax.jit, static_argnames=("tile_p",))
def ins_cross_entropy_loss(predict, labels, tile_p=16384):
    """predict: (N, C, H, W) float (f32 or bf16); labels: (N, H, W) int.

    Returns the scalar mean cross-entropy over pixels whose remapped label is valid.
    """
    n, c, h, w = predict.shape
    hw = h * w

    # Free reshapes only -- no transpose, no pad, no dtype upcast in HBM.
    logits = predict.reshape(n, c, hw)
    lab = labels.reshape(n, 1, hw).astype(jnp.int32)

    # Lane-aligned pixel tile; a full-extent tile (tp == hw) is always legal.
    tile_p = max(128, (tile_p // 128) * 128)
    tp = hw if hw <= tile_p else tile_p
    grid_p = pl.cdiv(hw, tp)

    parts = pl.pallas_call(
        functools.partial(_ins_ce_kernel, hw=hw, tile_p=tp),
        out_shape=jax.ShapeDtypeStruct((n, grid_p, 8, 128), jnp.float32),
        grid_spec=pltpu.PrefetchScalarGridSpec(
            num_scalar_prefetch=0,
            grid=(n, grid_p),
            in_specs=[
                # logits: (C, TP) lane-dense tile, native dtype (cast in-kernel)
                pl.BlockSpec((None, c, tp), lambda b, i: (b, 0, i)),
                # labels: (1, TP) tile
                pl.BlockSpec((None, 1, tp), lambda b, i: (b, 0, i)),
            ],
            # one (8,128) partial tile per grid step -> both axes can be "parallel"
            out_specs=pl.BlockSpec((None, None, 8, 128),
                                   lambda b, i: (b, i, 0, 0)),
        ),
        compiler_params=pltpu.CompilerParams(
            dimension_semantics=("parallel", "parallel")),
    )(logits, lab)

    loss_sum = jnp.sum(parts[:, :, 0, 0])
    cnt = jnp.sum(parts[:, :, 1, 0])
    # F.cross_entropy(..., size_average=True): mean over the valid (non-ignored) pixels.
    # cnt == 0 -> NaN, matching PyTorch when every pixel is ignored.
    return loss_sum / cnt


def _reference(predict, labels):
    """Pure-JAX reference mirroring the PyTorch forward."""
    n, c, h, w = predict.shape
    target = jnp.full(labels.shape, IGNORE, dtype=jnp.int32)
    for k, v in ID_TO_TRAINID:
        target = jnp.where(labels == v, k, target)
    valid = jnp.logical_and(target >= 0, target != IGNORE)
    logits = jnp.transpose(predict, (0, 2, 3, 1)).reshape(-1, c).astype(jnp.float32)
    tgt = target.reshape(-1)
    vld = valid.reshape(-1)
    lse = jax.nn.logsumexp(logits, axis=-1)
    picked = jnp.take_along_axis(logits, jnp.clip(tgt, 0, c - 1)[:, None], axis=-1)[:, 0]
    per = jnp.where(vld, lse - picked, 0.0)
    return jnp.sum(per) / jnp.sum(vld.astype(jnp.float32))


if __name__ == "__main__":
    key = jax.random.PRNGKey(0)
    k1, k2 = jax.random.split(key)

    N, C, H, W = 2, 11, 16, 16          # 11 classes = len(id_to_trainid)
    predict = jax.random.normal(k1, (N, C, H, W), dtype=jnp.float32)
    # raw labels in [0, 20): some map to trainids (values 5..18), the rest -> ignore(255)
    labels = jax.random.randint(k2, (N, H, W), 0, 20, dtype=jnp.int32)

    loss = ins_cross_entropy_loss(predict, labels)
    jax.block_until_ready(loss)

    ref = _reference(predict, labels)
    assert jnp.allclose(loss, ref, rtol=1e-5, atol=1e-5), (loss, ref)
    print("KERNEL_OK")
</pallas_src>

<mosaic_0001>
module attributes {stable_mosaic.version = 11 : i64} {
  func.func @_ins_ce_kernel(%arg0: i32, %arg1: i32, %arg2: memref<1x11x256xf32, #tpu.memory_space<vmem>>, %arg3: memref<1x1x256xi32, #tpu.memory_space<vmem>>, %arg4: memref<1x1x8x128xf32, #tpu.memory_space<vmem>>) attributes {dimension_semantics = [#tpu.dimension_semantics<parallel>, #tpu.dimension_semantics<parallel>], iteration_bounds = array<i64: 2, 1>, scalar_prefetch = 0 : i64, scratch_operands = 0 : i64, tpu.core_type = #tpu.core_type<tc>, window_params = [{transform_indices = @transform_0, window_bounds = array<i64: 1, 11, 256>}, {transform_indices = @transform_1, window_bounds = array<i64: 1, 1, 256>}, {transform_indices = @transform_2, window_bounds = array<i64: 1, 1, 8, 128>}]} {
    %c0 = arith.constant 0 : index
    %c0_0 = arith.constant 0 : index
    %c0_1 = arith.constant 0 : index
    %0 = vector.load %arg2[%c0, %c0_0, %c0_1] : memref<1x11x256xf32, #tpu.memory_space<vmem>>, vector<1x11x256xf32>
    %1 = vector.shape_cast %0 : vector<1x11x256xf32> to vector<11x256xf32>
    %c0_2 = arith.constant 0 : index
    %c0_3 = arith.constant 0 : index
    %c0_4 = arith.constant 0 : index
    %2 = vector.load %arg3[%c0_2, %c0_3, %c0_4] : memref<1x1x256xi32, #tpu.memory_space<vmem>>, vector<1x1x256xi32>
    %3 = vector.shape_cast %2 : vector<1x1x256xi32> to vector<1x256xi32>
    %c255_i32 = arith.constant 255 : i32
    %4 = vector.broadcast %c255_i32 : i32 to vector<1x256xi32>
    %c5_i32 = arith.constant 5 : i32
    %5 = vector.broadcast %c5_i32 : i32 to vector<1x256xi32>
    %6 = arith.cmpi eq, %3, %5 : vector<1x256xi32>
    %c0_i32 = arith.constant 0 : i32
    %7 = vector.broadcast %c0_i32 : i32 to vector<1x256xi32>
    %8 = arith.select %6, %7, %4 : vector<1x256xi1>, vector<1x256xi32>
    %c6_i32 = arith.constant 6 : i32
    %9 = vector.broadcast %c6_i32 : i32 to vector<1x256xi32>
    %10 = arith.cmpi eq, %3, %9 : vector<1x256xi32>
    %c1_i32 = arith.constant 1 : i32
    %11 = vector.broadcast %c1_i32 : i32 to vector<1x256xi32>
    %12 = arith.select %10, %11, %8 : vector<1x256xi1>, vector<1x256xi32>
    %c7_i32 = arith.constant 7 : i32
    %13 = vector.broadcast %c7_i32 : i32 to vector<1x256xi32>
    %14 = arith.cmpi eq, %3, %13 : vector<1x256xi32>
    %c2_i32 = arith.constant 2 : i32
    %15 = vector.broadcast %c2_i32 : i32 to vector<1x256xi32>
    %16 = arith.select %14, %15, %12 : vector<1x256xi1>, vector<1x256xi32>
    %c11_i32 = arith.constant 11 : i32
    %17 = vector.broadcast %c11_i32 : i32 to vector<1x256xi32>
    %18 = arith.cmpi eq, %3, %17 : vector<1x256xi32>
    %c3_i32 = arith.constant 3 : i32
    %19 = vector.broadcast %c3_i32 : i32 to vector<1x256xi32>
    %20 = arith.select %18, %19, %16 : vector<1x256xi1>, vector<1x256xi32>
    %c12_i32 = arith.constant 12 : i32
    %21 = vector.broadcast %c12_i32 : i32 to vector<1x256xi32>
    %22 = arith.cmpi eq, %3, %21 : vector<1x256xi32>
    %c4_i32 = arith.constant 4 : i32
    %23 = vector.broadcast %c4_i32 : i32 to vector<1x256xi32>
    %24 = arith.select %22, %23, %20 : vector<1x256xi1>, vector<1x256xi32>
    %c13_i32 = arith.constant 13 : i32
    %25 = vector.broadcast %c13_i32 : i32 to vector<1x256xi32>
    %26 = arith.cmpi eq, %3, %25 : vector<1x256xi32>
    %c5_i32_5 = arith.constant 5 : i32
    %27 = vector.broadcast %c5_i32_5 : i32 to vector<1x256xi32>
    %28 = arith.select %26, %27, %24 : vector<1x256xi1>, vector<1x256xi32>
    %c14_i32 = arith.constant 14 : i32
    %29 = vector.broadcast %c14_i32 : i32 to vector<1x256xi32>
    %30 = arith.cmpi eq, %3, %29 : vector<1x256xi32>
    %c6_i32_6 = arith.constant 6 : i32
    %31 = vector.broadcast %c6_i32_6 : i32 to vector<1x256xi32>
    %32 = arith.select %30, %31, %28 : vector<1x256xi1>, vector<1x256xi32>
    %c15_i32 = arith.constant 15 : i32
    %33 = vector.broadcast %c15_i32 : i32 to vector<1x256xi32>
    %34 = arith.cmpi eq, %3, %33 : vector<1x256xi32>
    %c7_i32_7 = arith.constant 7 : i32
    %35 = vector.broadcast %c7_i32_7 : i32 to vector<1x256xi32>
    %36 = arith.select %34, %35, %32 : vector<1x256xi1>, vector<1x256xi32>
    %c16_i32 = arith.constant 16 : i32
    %37 = vector.broadcast %c16_i32 : i32 to vector<1x256xi32>
    %38 = arith.cmpi eq, %3, %37 : vector<1x256xi32>
    %c8_i32 = arith.constant 8 : i32
    %39 = vector.broadcast %c8_i32 : i32 to vector<1x256xi32>
    %40 = arith.select %38, %39, %36 : vector<1x256xi1>, vector<1x256xi32>
    %c17_i32 = arith.constant 17 : i32
    %41 = vector.broadcast %c17_i32 : i32 to vector<1x256xi32>
    %42 = arith.cmpi eq, %3, %41 : vector<1x256xi32>
    %c9_i32 = arith.constant 9 : i32
    %43 = vector.broadcast %c9_i32 : i32 to vector<1x256xi32>
    %44 = arith.select %42, %43, %40 : vector<1x256xi1>, vector<1x256xi32>
    %c18_i32 = arith.constant 18 : i32
    %45 = vector.broadcast %c18_i32 : i32 to vector<1x256xi32>
    %46 = arith.cmpi eq, %3, %45 : vector<1x256xi32>
    %c10_i32 = arith.constant 10 : i32
    %47 = vector.broadcast %c10_i32 : i32 to vector<1x256xi32>
    %48 = arith.select %46, %47, %44 : vector<1x256xi1>, vector<1x256xi32>
    %49 = tpu.iota {dimensions = array<i32: 1>} : vector<1x256xi32>
    %c256_i32 = arith.constant 256 : i32
    %50 = arith.muli %arg1, %c256_i32 : i32
    %51 = vector.broadcast %50 : i32 to vector<1x256xi32>
    %52 = arith.addi %51, %49 : vector<1x256xi32>
    %c256_i32_8 = arith.constant 256 : i32
    %53 = vector.broadcast %c256_i32_8 : i32 to vector<1x256xi32>
    %54 = arith.cmpi slt, %52, %53 : vector<1x256xi32>
    %c0_i32_9 = arith.constant 0 : i32
    %55 = vector.broadcast %c0_i32_9 : i32 to vector<1x256xi32>
    %56 = arith.cmpi sge, %48, %55 : vector<1x256xi32>
    %c255_i32_10 = arith.constant 255 : i32
    %57 = vector.broadcast %c255_i32_10 : i32 to vector<1x256xi32>
    %58 = arith.cmpi ne, %48, %57 : vector<1x256xi32>
    %59 = arith.andi %56, %58 : vector<1x256xi1>
    %60 = arith.andi %59, %54 : vector<1x256xi1>
    %cst = arith.constant dense<0xFF800000> : vector<256xf32>
    %61 = vector.multi_reduction <maximumf>, %1, %cst [0] : vector<11x256xf32> to vector<256xf32>
    %62 = vector.shape_cast %61 : vector<256xf32> to vector<1x256xf32>
    %63 = vector.broadcast %62 : vector<1x256xf32> to vector<11x256xf32>
    %64 = arith.subf %1, %63 : vector<11x256xf32>
    %65 = math.exp %64 : vector<11x256xf32>
    %cst_11 = arith.constant dense<0.000000e+00> : vector<256xf32>
    %66 = vector.multi_reduction <add>, %65, %cst_11 [0] : vector<11x256xf32> to vector<256xf32>
    %67 = vector.shape_cast %66 : vector<256xf32> to vector<1x256xf32>
    %68 = math.log %67 : vector<1x256xf32>
    %69 = arith.addf %68, %62 : vector<1x256xf32>
    %70 = tpu.iota {dimensions = array<i32: 0>} : vector<11x256xi32>
    %71 = vector.broadcast %48 : vector<1x256xi32> to vector<11x256xi32>
    %72 = arith.cmpi eq, %70, %71 : vector<11x256xi32>
    %73 = arith.extui %72 : vector<11x256xi1> to vector<11x256xi32>
    %74 = arith.sitofp %73 : vector<11x256xi32> to vector<11x256xf32>
    %75 = arith.mulf %1, %74 : vector<11x256xf32>
    %cst_12 = arith.constant dense<0.000000e+00> : vector<256xf32>
    %76 = vector.multi_reduction <add>, %75, %cst_12 [0] : vector<11x256xf32> to vector<256xf32>
    %77 = vector.shape_cast %76 : vector<256xf32> to vector<1x256xf32>
    %78 = arith.subf %69, %77 : vector<1x256xf32>
    %cst_13 = arith.constant 0.000000e+00 : f32
    %79 = vector.broadcast %cst_13 : f32 to vector<1x256xf32>
    %80 = arith.select %60, %78, %79 : vector<1x256xi1>, vector<1x256xf32>
    %81 = vector.shape_cast %80 : vector<1x256xf32> to vector<1x1x256xf32>
    %cst_14 = arith.constant dense<0.000000e+00> : vector<1xf32>
    %82 = vector.multi_reduction <add>, %81, %cst_14 [1, 2] : vector<1x1x256xf32> to vector<1xf32>
    %83 = vector.shape_cast %82 : vector<1xf32> to vector<1x1x1xf32>
    %84 = vector.extract %83[0, 0, 0] : f32 from vector<1x1x1xf32>
    %85 = arith.extui %60 : vector<1x256xi1> to vector<1x256xi32>
    %86 = arith.sitofp %85 : vector<1x256xi32> to vector<1x256xf32>
    %87 = vector.shape_cast %86 : vector<1x256xf32> to vector<1x1x256xf32>
    %cst_15 = arith.constant dense<0.000000e+00> : vector<1xf32>
    %88 = vector.multi_reduction <add>, %87, %cst_15 [1, 2] : vector<1x1x256xf32> to vector<1xf32>
    %89 = vector.shape_cast %88 : vector<1xf32> to vector<1x1x1xf32>
    %90 = vector.extract %89[0, 0, 0] : f32 from vector<1x1x1xf32>
    %91 = tpu.iota {dimensions = array<i32: 0>} : vector<8x128xi32>
    %c0_i32_16 = arith.constant 0 : i32
    %92 = vector.broadcast %c0_i32_16 : i32 to vector<8x128xi32>
    %93 = arith.cmpi eq, %91, %92 : vector<8x128xi32>
    %c1_i32_17 = arith.constant 1 : i32
    %94 = vector.broadcast %c1_i32_17 : i32 to vector<8x128xi32>
    %95 = arith.cmpi eq, %91, %94 : vector<8x128xi32>
    %cst_18 = arith.constant 0.000000e+00 : f32
    %96 = vector.broadcast %90 : f32 to vector<8x128xf32>
    %97 = vector.broadcast %cst_18 : f32 to vector<8x128xf32>
    %98 = arith.select %95, %96, %97 : vector<8x128xi1>, vector<8x128xf32>
    %99 = vector.broadcast %84 : f32 to vector<8x128xf32>
    %100 = arith.select %93, %99, %98 : vector<8x128xi1>, vector<8x128xf32>
    %c0_19 = arith.constant 0 : index
    %c0_20 = arith.constant 0 : index
    %c0_21 = arith.constant 0 : index
    %c0_22 = arith.constant 0 : index
    %101 = vector.load %arg4[%c0_19, %c0_20, %c0_21, %c0_22] : memref<1x1x8x128xf32, #tpu.memory_space<vmem>>, vector<1x1x8x128xf32>
    %102 = vector.shape_cast %101 : vector<1x1x8x128xf32> to vector<8x128xf32>
    %103 = vector.shape_cast %100 : vector<8x128xf32> to vector<1x1x8x128xf32>
    tpu.vector_store %arg4[%c0_19, %c0_20, %c0_21, %c0_22], %103 {strides = array<i32>} : memref<1x1x8x128xf32, #tpu.memory_space<vmem>>, vector<1x1x8x128xf32>,
    return
  }
  func.func @transform_0(%arg0: i32, %arg1: i32) -> (i32, i32, i32) {
    %c0_i32 = arith.constant 0 : i32
    %c0_i32_0 = arith.constant 0 : i32
    return %arg0, %c0_i32, %arg1 : i32, i32, i32
  }
  func.func @transform_1(%arg0: i32, %arg1: i32) -> (i32, i32, i32) {
    %c0_i32 = arith.constant 0 : i32
    %c0_i32_0 = arith.constant 0 : i32
    return %arg0, %c0_i32, %arg1 : i32, i32, i32
  }
  func.func @transform_2(%arg0: i32, %arg1: i32) -> (i32, i32, i32, i32) {
    %c0_i32 = arith.constant 0 : i32
    %c0_i32_0 = arith.constant 0 : i32
    %c0_i32_1 = arith.constant 0 : i32
    return %arg0, %arg1, %c0_i32, %c0_i32_0 : i32, i32, i32, i32
  }
}

</mosaic_0001>

<bundles_post_ra>
// kernel: ins_cross_entropy_loss.1
= control target key start
LH: loop header
LB: loop body
LE: loop exit
PB: predicated region body
PF: predicated region fallthrough
CT: control target
= control target key end

     0   :  { %s636_s9 = smov 0   ;;  %s638_s10 = smov 0   ;;  %s744_s0 = inlined_call_operand.vmem [shape: f32[2,11,256], index: 0, kind: input, shape index: {}]   ;;  %s745_s1 = inlined_call_operand.vmem [shape: s32[2,1,256], index: 1, kind: input, shape index: {}]   ;;  %s746_s2 = inlined_call_operand.vmem [shape: f32[2,1,8,128], index: 2, kind: output, shape index: {}]  }
   0x1   :  { %s640_s11 = smov 0  }
   0x2 LB: > { %s24_s12 = sadd.s32 1, %s611_s10  ;;  %p536_p0 = scmp.ge.s32.totalorder %s615_s11, 1  ;;  %s615_s11 = sphi %s640_s11, %s12_s11   ;;  %s611_s10 = sphi %s638_s10, %s748_s10   ;;  %s607_s9 = sphi %s636_s9, %s747_s9  }
   0x3   : > { %p26_p1 = scmp.ge.s32.totalorder %s24_s12, 2  ;;  %p149_p2 = scmp.lt.s32.totalorder %s615_s11, 3 }
   0x5   : > { %s750_s12 = smov (%p26_p1, %s24_s12), 0  ;;  %p150_p3 = pnand %p536_p0, %p149_p2 }
   0x6   : > { %p186_p4 = scmp.lt.s32.totalorder (!%p150_p3), %s607_s9, 1  ;;  %vm269_vm0 = vcmask (!%p150_p3), 1042432   ;;  %v617_v5 = vmov (!%p150_p3), 255   ;;  %v256_v17 = vlaneseq (!%p150_p3)  ;;  %v618_v48 = vmov (!%p150_p3), 0.0  }
   0x7   : > { %153 = sbr.rel (%p150_p3) target bundleno = 308 (0x134), region = 28 }
   0x8   : > { %v678_v25 = vshrl.u32 (!%p150_p3), %v256_v17, 7  ;;  %v619_v17 = vmov (!%p150_p3), 1966171168  }
   0xa   : > { %v681_v31 = vsub.s32 (!%p150_p3), 0, %v678_v25  ;;  %v688_v35 = vsub.s32 (!%p150_p3), 1, %v678_v25  ;;  %v322_v39 = vadd.s32 (!%p150_p3), 8, %v678_v25 }
   0xe   : > { %s752_s9 = smov (!%p186_p4, %s607_s9), 1 }
   0xf   : > { %s548_s13 = sshll.u32 %s752_s9, 5  ;;  %s539_s14 = sshll.u32 %s752_s9, 1 }
  0x10   : > { %s193_s17 = scalar_lea.vmem %s744_s0, %s548_s13  ;;  %s202_s20 = scalar_lea.vmem %s745_s1, %s539_s14 }
  0x11   : > { %v664_v0 = vld [vmem:[%s193_s17 + $0x10] sm:$0x7]  ;;  %v215_v1 = vld [vmem:[%s202_s20] sm:$0x3]  ;;  %v670_v4 = vld [vmem:[%s193_s17 + $0x18] sm:$0x7] }
  0x12   : > { %v666_v2 = vld [vmem:[%s193_s17] sm:$0xff]  ;;  %vm216_vm1 = vcmp.eq.s32.totalorder %v215_v1, 5  ;;  %vm218_vm2 = vcmp.eq.s32.totalorder %v215_v1, 6  ;;  %vm220_vm3 = vcmp.eq.s32.totalorder %v215_v1, 7  ;;  %v270_v3 = vsel %vm269_vm0, %v664_v0, -inf  ;;  %v672_v7 = vld [vmem:[%s193_s17 + $0x8] sm:$0xff] }
  0x13   : > { %v217_v6 = vsel %vm216_vm1, 0, %v617_v5  ;;  %vm222_vm4 = vcmp.eq.s32.totalorder %v215_v1, 11  ;;  %vm224_vm5 = vcmp.eq.s32.totalorder %v215_v1, 12  ;;  %vm226_vm6 = vcmp.eq.s32.totalorder %v215_v1, 13  ;;  %s540_s21 = sshll.u32 %s752_s9, 3 }
  0x14   : > { %v219_v8 = vsel %vm218_vm2, 1, %v217_v6  ;;  %v271_v10 = vmax.f32 %v666_v2, %v270_v3  ;;  %vm228_vm7 = vcmp.eq.s32.totalorder %v215_v1, 14  ;;  %v278_v12 = vsel %vm269_vm0, %v670_v4, -inf  ;;  %s210_s26 = scalar_lea.vmem %s746_s2, %s540_s21 }
  0x15   : > { %v221_v9 = vsel %vm220_vm3, 2, %v219_v8  ;;  %vm230_vm8 = vcmp.eq.s32.totalorder %v215_v1, 15  ;;  %v279_v15 = vmax.f32 %v672_v7, %v278_v12  ;;  %vm232_vm9 = vcmp.eq.s32.totalorder %v215_v1, 16 }
  0x16   : > { %v223_v11 = vsel %vm222_vm4, 3, %v221_v9  ;;  %v272_v14 = vrot.slane %v271_v10, 4  ;;  %vm234_vm10 = vcmp.eq.s32.totalorder %v215_v1, 17  ;;  %vm236_vm11 = vcmp.eq.s32.totalorder %v215_v1, 18 }
  0x17   : > { %v225_v13 = vsel %vm224_vm5, 4, %v223_v11  ;;  %v280_v20 = vrot.slane %v279_v15, 4  ;;  %vm395_vm5 = vcmask 1040384  }
  0x18   : > { %v227_v16 = vsel %vm226_vm6, 5, %v225_v13  ;;  %v273_v19 = vmax.f32 %v271_v10, %v272_v14  ;;  %vm434_vm6 = vcmp.eq.s32.totalorder %v678_v25, 1 }
  0x19   : > { %v229_v18 = vsel %vm228_vm7, 6, %v227_v16  ;;  %v281_v24 = vmax.f32 %v279_v15, %v280_v20  ;;  %vm433_vm7 = vcmp.eq.s32.totalorder %v678_v25, 0 }
  0x1a   : > { %v231_v21 = vsel %vm230_vm8, 7, %v229_v18  ;;  %v274_v23 = vrot.slane %v273_v19, 2  ;;  %v254_v18 = vunpack.c.l.s4 %v619_v17 }
  0x1b   : > { %v233_v22 = vsel %vm232_vm9, 8, %v231_v21  ;;  %v282_v27 = vrot.slane %v281_v24, 2 }
  0x1c   : > { %v275_v26 = vmax.f32 %v273_v19, %v274_v23  ;;  %v235_v28 = vsel %vm234_vm10, 9, %v233_v22 }
  0x1d   : > { %v283_v30 = vmax.f32 %v281_v24, %v282_v27  ;;  %v683_v32 = vsel %vm236_vm11, 10, %v235_v28  ;;  %v255_v24 = vunpack.c.0.s8 %v254_v18  ;;  %v620_v28 = vmov 1  }
  0x1e   : > { %v276_v29 = vrot.slane %v275_v26, 1  ;;  %v326_v40 = vrot.slane %v683_v32, %v681_v31  ;;  %v330_v45 = vrot.slane %v683_v32, %v688_v35  ;;  %vm248_vm1 = vcmp.ne.s32.totalorder %v683_v32, 255 }
  0x1f   : > { %v284_v34 = vrot.slane %v283_v30, 1 }
  0x20   : > { %v685_v33 = vmax.f32 %v275_v26, %v276_v29  ;;  %vm333_vm12 = vcmp.eq.s32.totalorder %v322_v39, %v326_v40  ;;  %vm334_vm13 = vcmp.eq.s32.totalorder %v322_v39, %v330_v45  ;;  %vm331_vm14 = vcmp.eq.s32.totalorder %v678_v25, %v326_v40 }
  0x21   : > { %v690_v36 = vmax.f32 %v283_v30, %v284_v34  ;;  %v543_v49 = vsel %vm333_vm12, 1.0, %v618_v48  ;;  %vm332_vm15 = vcmp.eq.s32.totalorder %v678_v25, %v330_v45  ;;  %v544_v50 = vsel %vm334_vm13, 1.0, %v618_v48 }
  0x22   : > { %v286_v37 = vsub.f32 %v666_v2, %v685_v33  ;;  %v288_v38 = vsub.f32 %v664_v0, %v685_v33  ;;  %v541_v51 = vsel %vm331_vm14, 1.0, %v618_v48  ;;  %v345_v52 = vmul.f32 %v543_v49, %v664_v0 }
  0x23   : > { %v287_v41 = vsub.f32 %v672_v7, %v690_v36  ;;  %v289_v42 = vsub.f32 %v670_v4, %v690_v36  ;;  %v542_v53 = vsel %vm332_vm15, 1.0, %v618_v48  ;;  %v346_v54 = vmul.f32 %v544_v50, %v670_v4 }
  0x24   : > { %v290_v43 = vmul.f32 1.442695, %v286_v37  ;;  %v294_v44 = vmul.f32 1.442695, %v288_v38  ;;  %v343_v56 = vmul.f32 %v541_v51, %v666_v2  ;;  %v347_v58 = vsel %vm269_vm0, %v345_v52, 0.0 }
  0x25   : > { %v292_v46 = vmul.f32 1.442695, %v287_v41  ;;  %v296_v47 = vmul.f32 1.442695, %v289_v42  ;;  %v344_v61 = vmul.f32 %v542_v53, %v672_v7  ;;  %v355_v1 = vsel %vm269_vm0, %v346_v54, 0.0 }
  0x26   : > { %581 = vpow2.f32 %v290_v43  ;;  %v348_v3 = vadd.f32 %v347_v58, %v343_v56  ;;  %v252_v29 = vcombine.low %v620_v28, %v620_v28  ;;  %v258_v30 = vsub.s32 %v255_v24, %v678_v25 }
  0x27   : > { %583 = vpow2.f32 %v294_v44  ;;  %v356_v6 = vadd.f32 %v355_v1, %v344_v61 }
  0x28   : > { %585 = vpow2.f32 %v292_v46  ;;  %v349_v9 = vrot.slane %v348_v3, 4  ;;  %v259_v38 = vrot.slane %v252_v29, %v258_v30 }
  0x29   : > { %587 = vpow2.f32 %v296_v47  ;;  %v357_v12 = vrot.slane %v356_v6, 4 }
  0x2a   : > { %v350_v15 = vadd.f32 %v349_v9, %v348_v3  ;;  %v266_v44 = vrot.slane %v259_v38, %v258_v30 }
  0x2b   : > { %v358_v19 = vadd.f32 %v357_v12, %v356_v6 }
  0x2c   : > { %v351_v22 = vrot.slane %v350_v15, 2  ;;  %vm267_vm3 = vcmp.ne.s32.totalorder %v266_v44, 0 }
  0x2d   : > { %v359_v26 = vrot.slane %v358_v19, 2 }
  0x2e   : > { %v352_v27 = vadd.f32 %v351_v22, %v350_v15 }
  0x2f   : > { %v360_v34 = vadd.f32 %v359_v26, %v358_v19 }
  0x30   : > { %v582_v55 = vpop.eup %581  ;;  %v353_v37 = vrot.slane %v352_v27, 1 }
  0x31   : > { %v584_v57 = vpop.eup %583  ;;  %v361_v39 = vrot.slane %v360_v34, 1 }
  0x32   : > { %v586_v59 = vpop.eup %585  ;;  %v298_v60 = vsel %vm269_vm0, %v584_v57, 0.0  ;;  %v354_v42 = vadd.f32 %v353_v37, %v352_v27 }
  0x33   : > { %v588_v62 = vpop.eup %587  ;;  %v299_v63 = vadd.f32 %v582_v55, %v298_v60  ;;  %v362_v47 = vadd.f32 %v361_v39, %v360_v34 }
  0x34   : > { %v306_v0 = vsel %vm269_vm0, %v588_v62, 0.0  ;;  %vm247_vm0 = vcmp.ge.s32.totalorder %v683_v32, 0 }
  0x35   : > { %v300_v5 = vrot.slane %v299_v63, 4  ;;  %v307_v4 = vadd.f32 %v586_v59, %v306_v0  ;;  %vm249_vm2 = vmand %vm247_vm0, %vm248_vm1 }
  0x36   : > { %vm268_vm4 = vmand %vm249_vm2, %vm267_vm3 }
  0x37   : > { %v301_v8 = vadd.f32 %v300_v5, %v299_v63  ;;  %v308_v2 = vrot.slane %v307_v4, 4  ;;  %v545_v54 = vsel %vm268_vm4, 1.0, %v618_v48 }
  0x38   : > { %v414_v56 = vrot.slane %v545_v54, %v681_v31 }
  0x39   : > { %v302_v10 = vrot.slane %v301_v8, 2  ;;  %v309_v11 = vadd.f32 %v308_v2, %v307_v4 }
  0x3a   : > { %v421_v60 = vsel %vm395_vm5, %v414_v56, 0.0 }
  0x3b   : > { %v303_v13 = vadd.f32 %v302_v10, %v301_v8  ;;  %v310_v14 = vrot.slane %v309_v11, 2 }
  0x3d   : > { %v304_v7 = vrot.slane %v303_v13, 1  ;;  %v311_v16 = vadd.f32 %v310_v14, %v309_v11 }
  0x3f   : > { %v305_v20 = vadd.f32 %v304_v7, %v303_v13  ;;  %v312_v21 = vrot.slane %v311_v16, 1 }
  0x41   : > { %v313_v23 = vadd.f32 %v312_v21, %v311_v16  ;;  %589 = vlog2.f32 %v305_v20 }
  0x43   : > { %591 = vlog2.f32 %v313_v23 }
  0x4b   : > { %v590_v40 = vpop.eup %589 }
  0x4c   : > { %v315_v41 = vmul.f32 0.6931472, %v590_v40 }
  0x4d   : > { %v592_v43 = vpop.eup %591 }
  0x4e   : > { %v317_v45 = vmul.f32 0.6931472, %v592_v43  ;;  %v318_v46 = vadd.f32 %v315_v41, %v685_v33  ;;  %v418_v33 = vrot.slane %v545_v54, %v688_v35 }
  0x50   : > { %v319_v49 = vadd.f32 %v317_v45, %v690_v36  ;;  %v363_v50 = vsub.f32 %v318_v46, %v354_v42  ;;  %v422_v61 = vsel %vm395_vm5, %v418_v33, 0.0 }
  0x51   : > { %v423_v63 = vadd.f32 %v422_v61, %v421_v60 }
  0x52   : > { %v364_v51 = vsub.f32 %v319_v49, %v362_v47 }
  0x54   : > { %v367_v52 = vcombine.low %v363_v50, %v364_v51 }
  0x56   : > { %v374_v53 = vrot.slane %v367_v52, %v258_v30 }
  0x58   : > { %v381_v55 = vrot.slane %v374_v53, %v258_v30 }
  0x5a   : > { %v383_v57 = vsel %vm268_vm4, %v381_v55, 0.0 }
  0x5b   : > { %v388_v32 = vrot.slane %v383_v57, %v681_v31  ;;  %v392_v36 = vrot.slane %v383_v57, %v688_v35 }
  0x5d   : > { %v396_v58 = vsel %vm395_vm5, %v388_v32, 0.0  ;;  %v397_v59 = vsel %vm395_vm5, %v392_v36, 0.0 }
  0x5e   : > { %v398_v62 = vadd.f32 %v397_v59, %v396_v58 }
  0x60   : > { %399 = vadd.xlane.f32.xlu0 %v398_v62 }
  0x64   : > { %424 = vadd.xlane.f32.xlu0 %v423_v63 }
  0xed   : > { %v400_v48 = vpop.xlane.xlu0 %399 }
  0xee   : > { %v401_v1 = vrot.slane %v400_v48, 4 }
  0xf0   : > { %v402_v0 = vadd.f32 %v401_v1, %v400_v48 }
  0xf1   : > { %v425_v3 = vpop.xlane.xlu0 %424 }
  0xf2   : > { %v403_v5 = vrot.slane %v402_v0, 2  ;;  %v426_v4 = vrot.slane %v425_v3, 4 }
  0xf4   : > { %v427_v6 = vadd.f32 %v426_v4, %v425_v3  ;;  %v404_v8 = vadd.f32 %v403_v5, %v402_v0 }
  0xf6   : > { %v428_v31 = vrot.slane %v427_v6, 2  ;;  %v405_v2 = vrot.slane %v404_v8, 1 }
  0xf8   : > { %v429_v35 = vadd.f32 %v428_v31, %v427_v6  ;;  %v406_v9 = vadd.f32 %v405_v2, %v404_v8 }
  0xfa   : > { %549 = vpush %v406_v9  ;;  %v430_v10 = vrot.slane %v429_v35, 1 }
  0xfc   : > { %v431_v11 = vadd.f32 %v430_v10, %v429_v35 }
  0xfe   : > { %551 = vpush %v431_v11 }
 0x12b   : > { %s550_s22 = spop %549 }
 0x12c   : > { %v437_v13 = vstv %s550_s22 }
 0x12f   : > { %s552_s23 = spop %551 }
 0x130   : > { %v435_v12 = vstv %s552_s23 }
 0x131   : > { %v436_v14 = vsel %vm434_vm6, %v435_v12, 0.0 }
 0x132   : > { %v438_v15 = vsel %vm433_vm7, %v437_v13, %v436_v14 }
 0x133   : > { %439 = vst [vmem:[%s210_s26] sm:$0xff] %v438_v15 }
 0x134 PF: > { %s12_s11 = sadd.s32 1, %s615_s11   ;;  %s747_s9 = smov %s611_s10 }
 0x135   : > { %p9_p5 = scmp.ge.s32.totalorder %s12_s11, 4   ;;  %s748_s10 = smov %s750_s12 }
 0x137   :  { %11 = sbr.rel (!%p9_p5) target bundleno = 2 (0x2), region = 61 }

</bundles_post_ra>
